<compile_context>
chip_gen: v6e
topology: v6e:2x2x1
jax: 0.10.0
libtpu: 0.0.40
codegen_flags: <defaults>
</compile_context>

<pallas_src>
import math

import jax
import jax.numpy as jnp
from jax.experimental import pallas as pl
from jax.experimental.pallas import tpu as pltpu


def _get_pad(size: int, multiple: int):
    new_size = math.ceil(size / multiple) * multiple
    pad = new_size - size
    left = pad // 2
    return left, pad - left


def _round_up(x: int, m: int) -> int:
    return -(-x // m) * m


def _sublane_tile(dtype) -> int:
    # f32 -> 8 sublanes, bf16 -> 16, int8/fp8 -> 32 (packed sublanes).
    itemsize = jnp.dtype(dtype).itemsize
    return max(8, 32 // itemsize)


def _vmem_capacity_bytes() -> int:
    try:
        info = pltpu.get_tpu_info()
        cap = getattr(info, "vmem_capacity_bytes", None)
        if cap:
            return int(cap)
    except Exception:
        pass
    # Conservative fallback (v7x-sized VMEM): safe on every generation.
    return 64 * 1024 * 1024


def _num_tensorcores() -> int:
    try:
        kind = (getattr(jax.devices()[0], "device_kind", "") or "").lower()
        if "v7" in kind or "tpu7" in kind:
            return 2
    except Exception:
        pass
    return 1


def center_padding(x: jax.Array, multiple: int) -> jax.Array:
    """Pallas implementation of CenterPadding.forward for NCHW inputs."""
    assert x.ndim == 4, "center_padding expects NCHW input"
    N, C, H, W = x.shape
    ph_l, ph_r = _get_pad(H, multiple)
    pw_l, pw_r = _get_pad(W, multiple)

    # Common case: already aligned -> no kernel launch, no HBM copy.
    if (ph_l + ph_r) == 0 and (pw_l + pw_r) == 0:
        return x

    Hp = H + ph_l + ph_r
    Wp = W + pw_l + pw_r
    NC = N * C

    dtype = x.dtype
    itemsize = jnp.dtype(dtype).itemsize
    sub = _sublane_tile(dtype)

    vmem_cap = _vmem_capacity_bytes()
    cores = _num_tensorcores()
    # Per-step (in + out) *layout-padded* byte budget and default scoped limit:
    #   v7x (64 MiB):  ~10.7 MiB / step, limit 32 MiB
    #   v6e/v5e (128): ~21.3 MiB / step, limit 64 MiB
    budget = vmem_cap // 6
    default_limit = vmem_cap // 2

    cost = pl.CostEstimate(
        flops=0,
        transcendentals=0,
        bytes_accessed=NC * (H * W + Hp * Wp) * itemsize,
    )

    # ------------------------------------------------------------------
    # Path 1: H-only padding -> flatten (H, W) into a lane-dense last axis.
    # The whole kernel is one lane shift (XLU) plus full-width unmasked stores.
    # ------------------------------------------------------------------
    if (pw_l + pw_r) == 0:
        HW, HpW = H * W, Hp * W
        in_row = _round_up(HW, 128) * itemsize
        out_row = _round_up(HpW, 128) * itemsize
        per_row = in_row + out_row

        if NC <= sub:
            B_blk = NC  # full leading dim -> no sublane-alignment concern
        else:
            fit = max(1, budget // per_row)
            # Keep the sublane (second-to-last) block dim a multiple of the tile.
            B_blk = max(sub, (fit // sub) * sub)
            if cores >= 2:
                target = min(2 * cores, NC)
                want = max(sub, _round_up(pl.cdiv(NC, target), sub))
                B_blk = min(B_blk, want)
            B_blk = min(B_blk, NC)

        steps = pl.cdiv(NC, B_blk)
        step_rows = _round_up(B_blk, sub)
        step_bytes = step_rows * per_row
        vmem_limit = max(
            default_limit,
            min(int(vmem_cap * 0.9),
                2 * step_bytes + step_rows * out_row + (2 << 20)),
        )

        def kernel2d(x_ref, o_ref):
            v = x_ref[...]
            parts = []
            if ph_l:
                parts.append(jnp.zeros((B_blk, ph_l * W), dtype=v.dtype))
            parts.append(v)
            if ph_r:
                parts.append(jnp.zeros((B_blk, ph_r * W), dtype=v.dtype))
            # Full-block, lane-aligned store; the shift happens in-register.
            o_ref[...] = jnp.concatenate(parts, axis=1)

        out_flat = pl.pallas_call(
            kernel2d,
            out_shape=jax.ShapeDtypeStruct((NC, HpW), dtype),
            grid=(steps,),
            in_specs=[pl.BlockSpec((B_blk, HW), lambda i: (i, 0))],
            out_specs=pl.BlockSpec((B_blk, HpW), lambda i: (i, 0)),
            compiler_params=pltpu.CompilerParams(
                dimension_semantics=("parallel",),
                vmem_limit_bytes=int(vmem_limit),
            ),
            cost_estimate=cost,
        )(x.reshape(NC, HW))
        return out_flat.reshape(N, C, Hp, W)

    # ------------------------------------------------------------------
    # Path 2: general case (W padding, possibly H padding too).
    # Pad in-register and write the whole (B, Hp, Wp) block fully aligned.
    # ------------------------------------------------------------------
    in_item = _round_up(H, sub) * _round_up(W, 128) * itemsize
    out_item = _round_up(Hp, sub) * _round_up(Wp, 128) * itemsize
    per_item = in_item + out_item

    B_blk = max(1, budget // per_item)
    B_blk = min(B_blk, NC)
    if cores >= 2 and NC >= 2:
        # >= 2 grid steps per TensorCore so both v7x cores get overlap.
        target = min(2 * cores, NC)
        B_blk = min(B_blk, pl.cdiv(NC, target))
    steps = pl.cdiv(NC, B_blk)

    # TODO(synk): if a single (H, W) item exceeds the budget (huge images),
    # add a sublane-aligned H-tiling grid axis instead of just raising the
    # scoped VMEM limit below.
    step_bytes = B_blk * per_item
    vmem_limit = max(
        default_limit,
        min(int(vmem_cap * 0.9),
            2 * step_bytes + B_blk * out_item + (2 << 20)),
    )

    def kernel3d(x_ref, o_ref):
        v = x_ref[...]
        if pw_l or pw_r:
            parts = []
            if pw_l:
                parts.append(jnp.zeros((B_blk, H, pw_l), dtype=v.dtype))
            parts.append(v)
            if pw_r:
                parts.append(jnp.zeros((B_blk, H, pw_r), dtype=v.dtype))
            v = jnp.concatenate(parts, axis=2)
        if ph_l or ph_r:
            parts = []
            if ph_l:
                parts.append(jnp.zeros((B_blk, ph_l, Wp), dtype=v.dtype))
            parts.append(v)
            if ph_r:
                parts.append(jnp.zeros((B_blk, ph_r, Wp), dtype=v.dtype))
            v = jnp.concatenate(parts, axis=1)
        # Single full-block, lane/sublane-aligned store.
        o_ref[...] = v

    out_flat = pl.pallas_call(
        kernel3d,
        out_shape=jax.ShapeDtypeStruct((NC, Hp, Wp), dtype),
        grid=(steps,),
        in_specs=[pl.BlockSpec((B_blk, H, W), lambda i: (i, 0, 0))],
        out_specs=pl.BlockSpec((B_blk, Hp, Wp), lambda i: (i, 0, 0)),
        compiler_params=pltpu.CompilerParams(
            dimension_semantics=("parallel",),
            vmem_limit_bytes=int(vmem_limit),
        ),
        cost_estimate=cost,
    )(x.reshape(NC, H, W))
    return out_flat.reshape(N, C, Hp, Wp)


def _reference(x, multiple):
    ph_l, ph_r = _get_pad(x.shape[2], multiple)
    pw_l, pw_r = _get_pad(x.shape[3], multiple)
    return jnp.pad(x, ((0, 0), (0, 0), (ph_l, ph_r), (pw_l, pw_r)))


if __name__ == "__main__":
    key = jax.random.PRNGKey(0)
    multiple = 7

    # Case 1: both H and W padded asymmetrically (16 -> 21: left 2, right 3).
    N, C, H, W = 2, 4, 16, 16
    x = jax.random.normal(key, (N, C, H, W), dtype=jnp.float32)
    out = jax.block_until_ready(center_padding(x, multiple))
    ref = _reference(x, multiple)
    assert out.shape == ref.shape, (out.shape, ref.shape)
    assert out.dtype == ref.dtype, (out.dtype, ref.dtype)
    assert bool(jnp.allclose(out, ref)), "mismatch vs reference (case 1)"

    # Case 2: only H needs padding (W=14 already a multiple of 7) -> lane-dense path.
    x2 = jax.random.normal(key, (N, C, 16, 14), dtype=jnp.float32)
    out2 = jax.block_until_ready(center_padding(x2, multiple))
    ref2 = _reference(x2, multiple)
    assert out2.shape == ref2.shape and bool(jnp.allclose(out2, ref2)), \
        "mismatch vs reference (case 2)"

    # Case 3: no padding needed -> identity short-circuit.
    x3 = jax.random.normal(key, (N, C, 14, 14), dtype=jnp.float32)
    out3 = jax.block_until_ready(center_padding(x3, multiple))
    assert out3.shape == x3.shape and bool(jnp.allclose(out3, x3)), \
        "identity short-circuit failed (case 3)"

    print("KERNEL_OK")
</pallas_src>

<mosaic_0001>
module attributes {stable_mosaic.version = 11 : i64} {
  func.func @kernel3d(%arg0: i32, %arg1: memref<8x16x16xf32, #tpu.memory_space<vmem>>, %arg2: memref<8x21x21xf32, #tpu.memory_space<vmem>>) attributes {dimension_semantics = [#tpu.dimension_semantics<parallel>], iteration_bounds = array<i64: 1>, scalar_prefetch = 0 : i64, scratch_operands = 0 : i64, tpu.core_type = #tpu.core_type<tc>, window_params = [{transform_indices = @transform_0, window_bounds = array<i64: 8, 16, 16>}, {transform_indices = @transform_1, window_bounds = array<i64: 8, 21, 21>}]} {
    %c0 = arith.constant 0 : index
    %c0_0 = arith.constant 0 : index
    %c0_1 = arith.constant 0 : index
    %0 = vector.load %arg1[%c0, %c0_0, %c0_1] : memref<8x16x16xf32, #tpu.memory_space<vmem>>, vector<8x16x16xf32>
    %cst = arith.constant 0.000000e+00 : f32
    %1 = vector.broadcast %cst : f32 to vector<8x16x2xf32>
    %cst_2 = arith.constant 0.000000e+00 : f32
    %2 = vector.broadcast %cst_2 : f32 to vector<8x16x3xf32>
    %3 = tpu.concatenate %1, %0, %2 in 2 : vector<8x16x2xf32>, vector<8x16x16xf32>, vector<8x16x3xf32> -> vector<8x16x21xf32>
    %cst_3 = arith.constant 0.000000e+00 : f32
    %4 = vector.broadcast %cst_3 : f32 to vector<8x2x21xf32>
    %cst_4 = arith.constant 0.000000e+00 : f32
    %5 = vector.broadcast %cst_4 : f32 to vector<8x3x21xf32>
    %6 = tpu.concatenate %4, %3, %5 in 1 : vector<8x2x21xf32>, vector<8x16x21xf32>, vector<8x3x21xf32> -> vector<8x21x21xf32>
    %c0_5 = arith.constant 0 : index
    %c0_6 = arith.constant 0 : index
    %c0_7 = arith.constant 0 : index
    %7 = vector.load %arg2[%c0_5, %c0_6, %c0_7] : memref<8x21x21xf32, #tpu.memory_space<vmem>>, vector<8x21x21xf32>
    tpu.vector_store %arg2[%c0_5, %c0_6, %c0_7], %6 {strides = array<i32>} : memref<8x21x21xf32, #tpu.memory_space<vmem>>, vector<8x21x21xf32>,
    return
  }
  func.func @transform_0(%arg0: i32) -> (i32, i32, i32) {
    %c0_i32 = arith.constant 0 : i32
    %c0_i32_0 = arith.constant 0 : i32
    %c0_i32_1 = arith.constant 0 : i32
    return %arg0, %c0_i32, %c0_i32_0 : i32, i32, i32
  }
  func.func @transform_1(%arg0: i32) -> (i32, i32, i32) {
    %c0_i32 = arith.constant 0 : i32
    %c0_i32_0 = arith.constant 0 : i32
    %c0_i32_1 = arith.constant 0 : i32
    return %arg0, %c0_i32, %c0_i32_0 : i32, i32, i32
  }
}

</mosaic_0001>

<bundles_post_ra>
// kernel: tpu_custom_call.1
= control target key start
LH: loop header
LB: loop body
LE: loop exit
PB: predicated region body
PF: predicated region fallthrough
CT: control target
= control target key end

     0   :  { %6 = vsyncpa [#allocation3], 0  ;;  %s274_s6 = smov [#allocation2]   ;;  %s443_s0 = inlined_call_operand.hbm [shape: f32[8,16,16], index: 0, kind: input, shape index: {}]   ;;  %s444_s1 = inlined_call_operand.vmem [shape: f32[8,21,21], index: 1, kind: output, shape index: {}]  }
   0x1   :  { %s12_s7 = sshll.u32 %s274_s6, 4  ;;  %s13_s7 = int_to_ptr.vmem [resolvable:$true] %s12_s7 }
   0x2   :  { %s260_s8 = scalar_lea.vmem %s13_s7, 2048  ;;  %p265_p1 = scmp.lt.s32.totalorder %s13_s7, %s13_s7 }
   0x3   :  { %p261_p0 = scmp.ne.s32.totalorder %s13_s7, %s260_s8  ;;  %p266_p2 = scmp.lt.s32.totalorder %s260_s8, %s260_s8 }
   0x5   :  { %p267_p3 = por %p266_p2, %p265_p1 }
   0x7   :  { %p268_p4 = pnand %p267_p3, %p261_p0 }
   0x9   :  { %271 = shalt.err (!%p268_p4)
}
   0xa   :  { %s275_s9 = smov 128   ;;  %s276_s10 = smov 8  }
   0xb   :  { %18 = dma.hbm_to_vmem [thread:$0]  %s443_s0, 2048, %s13_s7, [#allocation3], %s275_s9, %s275_s9, %s276_s10  }
   0xc   :  { %272 = dma.done.wait [#allocation3], 2048  }
   0xd   :  { %273 = vsyncadd [#allocation3], 4294965248  ;;  %v24_v0 = vld [vmem:[#allocation2 + $0x10] sm:$0xff]  ;;  %v22_v1 = vld [vmem:[#allocation2] sm:$0xff]  ;;  %s277_s13 = smov 2   ;;  %vm102_vm0 = vcmask 15360  }
   0xe   :  { %58 = vrot.lane.b32.xlu1 %v24_v0, %s277_s13  ;;  %54 = vrot.lane.b32.xlu0 %v22_v1, %s277_s13  ;;  %v25_v2 = vld [vmem:[#allocation2 + $0x18] sm:$0xff]  ;;  %v23_v3 = vld [vmem:[#allocation2 + $0x8] sm:$0xff]  ;;  %v26_v5 = vld [vmem:[#allocation2 + $0x20] sm:$0xff]  ;;  %vm119_vm1 = vcmask 146432   ;;  %vm152_vm2 = vcmask 1041408   ;;  %vm217_vm3 = vcmask 171008  }
   0xf   :  { %v27_v4 = vld [vmem:[#allocation2 + $0x28] sm:$0xff]  ;;  %v29_v6 = vld [vmem:[#allocation2 + $0x38] sm:$0xff]  ;;  %v28_v7 = vld [vmem:[#allocation2 + $0x30] sm:$0xff]  ;;  %vm220_vm4 = vcmask 167936  }
  0x10   :  { %v31_v8 = vld [vmem:[#allocation2 + $0x48] sm:$0xff]  ;;  %v30_v9 = vld [vmem:[#allocation2 + $0x40] sm:$0xff]  ;;  %v33_v10 = vld [vmem:[#allocation2 + $0x58] sm:$0xff] }
  0x11   :  { %v32_v11 = vld [vmem:[#allocation2 + $0x50] sm:$0xff]  ;;  %v35_v12 = vld [vmem:[#allocation2 + $0x68] sm:$0xff]  ;;  %v34_v13 = vld [vmem:[#allocation2 + $0x60] sm:$0xff] }
  0x12   :  { %60 = vrot.lane.b32.xlu1 %v25_v2, %s277_s13  ;;  %56 = vrot.lane.b32.xlu0 %v23_v3, %s277_s13  ;;  %v37_v14 = vld [vmem:[#allocation2 + $0x78] sm:$0xff]  ;;  %v36_v15 = vld [vmem:[#allocation2 + $0x70] sm:$0xff] }
  0x16   :  { %64 = vrot.lane.b32.xlu1 %v27_v4, %s277_s13  ;;  %62 = vrot.lane.b32.xlu0 %v26_v5, %s277_s13 }
  0x1a   :  { %68 = vrot.lane.b32.xlu1 %v29_v6, %s277_s13  ;;  %66 = vrot.lane.b32.xlu0 %v28_v7, %s277_s13 }
  0x1e   :  { %72 = vrot.lane.b32.xlu1 %v31_v8, %s277_s13  ;;  %70 = vrot.lane.b32.xlu0 %v30_v9, %s277_s13 }
  0x22   :  { %76 = vrot.lane.b32.xlu1 %v33_v10, %s277_s13  ;;  %74 = vrot.lane.b32.xlu0 %v32_v11, %s277_s13 }
  0x26   :  { %80 = vrot.lane.b32.xlu1 %v35_v12, %s277_s13  ;;  %78 = vrot.lane.b32.xlu0 %v34_v13, %s277_s13 }
  0x2a   :  { %84 = vrot.lane.b32.xlu1 %v37_v14, %s277_s13  ;;  %82 = vrot.lane.b32.xlu0 %v36_v15, %s277_s13 }
  0x80   :  { %v59_v16 = vpop.permute.xlu1 %58  ;;  %v55_v17 = vpop.permute.xlu0 %54 }
  0x81   :  { %v105_v18 = vsel %vm102_vm0, 0.0, %v59_v16  ;;  %v103_v19 = vsel %vm102_vm0, 0.0, %v55_v17 }
  0x82   :  { %v122_v20 = vsel %vm119_vm1, %v105_v18, 0.0  ;;  %v120_v21 = vsel %vm119_vm1, %v103_v19, 0.0 }
  0x83   :  { %v156_v22 = vrot.slane %v122_v20, 6  ;;  %v153_v23 = vrot.slane %v120_v21, 6 }
  0x84   :  { %v61_v24 = vpop.permute.xlu1 %60  ;;  %v57_v25 = vpop.permute.xlu0 %56 }
  0x85   :  { %v202_v26 = vsel %vm152_vm2, 0.0, %v156_v22  ;;  %v201_v27 = vsel %vm152_vm2, 0.0, %v153_v23  ;;  %v106_v28 = vsel %vm102_vm0, 0.0, %v61_v24  ;;  %v104_v29 = vsel %vm102_vm0, 0.0, %v57_v25 }
  0x86   :  { %222 = vst.msk [vmem:[%s444_s1 + $0x18] sm:$0xff] %vm217_vm3, %v202_v26  ;;  %218 = vst.msk [vmem:[%s444_s1] sm:$0xff] %vm217_vm3, %v201_v27  ;;  %v123_v30 = vsel %vm119_vm1, %v106_v28, 0.0  ;;  %v121_v31 = vsel %vm119_vm1, %v104_v29, 0.0 }
  0x87   :  { %v157_v32 = vrot.slane %v123_v30, 6  ;;  %v154_v33 = vrot.slane %v121_v31, 6 }
  0x88   :  { %v65_v34 = vpop.permute.xlu1 %64  ;;  %v63_v35 = vpop.permute.xlu0 %62 }
  0x89   :  { %v158_v36 = vsel %vm152_vm2, %v156_v22, %v157_v32  ;;  %v210_v37 = vsel %vm152_vm2, %v157_v32, 0.0  ;;  %v155_v38 = vsel %vm152_vm2, %v153_v23, %v154_v33  ;;  %v209_v39 = vsel %vm152_vm2, %v154_v33, 0.0 }
  0x8a   :  { %223 = vst.msk [vmem:[%s444_s1 + $0x20] sm:$0xff] %vm217_vm3, %v158_v36  ;;  %219 = vst.msk [vmem:[%s444_s1 + $0x8] sm:$0xff] %vm217_vm3, %v155_v38  ;;  %v108_v40 = vsel %vm102_vm0, 0.0, %v65_v34  ;;  %v107_v41 = vsel %vm102_vm0, 0.0, %v63_v35 }
  0x8b   :  { %224 = vst.msk [vmem:[%s444_s1 + $0x28] sm:$0x1f] %vm220_vm4, %v210_v37  ;;  %221 = vst.msk [vmem:[%s444_s1 + $0x10] sm:$0x1f] %vm220_vm4, %v209_v39  ;;  %v125_v42 = vsel %vm119_vm1, %v108_v40, 0.0  ;;  %v124_v43 = vsel %vm119_vm1, %v107_v41, 0.0 }
  0x8c   :  { %v160_v44 = vrot.slane %v125_v42, 6  ;;  %v159_v45 = vrot.slane %v124_v43, 6  ;;  %v69_v46 = vpop.permute.xlu1 %68  ;;  %v67_v47 = vpop.permute.xlu0 %66 }
  0x8d   :  { %v110_v48 = vsel %vm102_vm0, 0.0, %v69_v46  ;;  %v109_v49 = vsel %vm102_vm0, 0.0, %v67_v47 }
  0x8e   :  { %v211_v50 = vsel %vm152_vm2, %v160_v44, 0.0  ;;  %v161_v51 = vsel %vm152_vm2, %v159_v45, %v160_v44  ;;  %v203_v52 = vsel %vm152_vm2, 0.0, %v159_v45  ;;  %v127_v53 = vsel %vm119_vm1, %v110_v48, 0.0 }
  0x8f   :  { %227 = vst.msk [vmem:[%s444_s1 + $0x40] sm:$0x1f] %vm220_vm4, %v211_v50  ;;  %v163_v54 = vrot.slane %v127_v53, 6  ;;  %v126_v55 = vsel %vm119_vm1, %v109_v49, 0.0 }
  0x90   :  { %225 = vst.msk [vmem:[%s444_s1 + $0x30] sm:$0xff] %vm217_vm3, %v203_v52  ;;  %226 = vst.msk [vmem:[%s444_s1 + $0x38] sm:$0xff] %vm217_vm3, %v161_v51  ;;  %v162_v56 = vrot.slane %v126_v55, 6  ;;  %v73_v57 = vpop.permute.xlu1 %72  ;;  %v71_v58 = vpop.permute.xlu0 %70 }
  0x91   :  { %v212_v59 = vsel %vm152_vm2, %v163_v54, 0.0  ;;  %v112_v60 = vsel %vm102_vm0, 0.0, %v73_v57  ;;  %v111_v61 = vsel %vm102_vm0, 0.0, %v71_v58 }
  0x92   :  { %230 = vst.msk [vmem:[%s444_s1 + $0x58] sm:$0x1f] %vm220_vm4, %v212_v59  ;;  %v164_v62 = vsel %vm152_vm2, %v162_v56, %v163_v54  ;;  %v204_v63 = vsel %vm152_vm2, 0.0, %v162_v56  ;;  %v129_v0 = vsel %vm119_vm1, %v112_v60, 0.0  ;;  %v128_v1 = vsel %vm119_vm1, %v111_v61, 0.0 }
  0x93   :  { %228 = vst.msk [vmem:[%s444_s1 + $0x48] sm:$0xff] %vm217_vm3, %v204_v63  ;;  %229 = vst.msk [vmem:[%s444_s1 + $0x50] sm:$0xff] %vm217_vm3, %v164_v62  ;;  %v166_v2 = vrot.slane %v129_v0, 6  ;;  %v165_v3 = vrot.slane %v128_v1, 6 }
  0x94   :  { %v77_v4 = vpop.permute.xlu1 %76  ;;  %v75_v5 = vpop.permute.xlu0 %74 }
  0x95   :  { %v213_v6 = vsel %vm152_vm2, %v166_v2, 0.0  ;;  %v167_v7 = vsel %vm152_vm2, %v165_v3, %v166_v2  ;;  %v205_v8 = vsel %vm152_vm2, 0.0, %v165_v3  ;;  %v114_v9 = vsel %vm102_vm0, 0.0, %v77_v4 }
  0x96   :  { %233 = vst.msk [vmem:[%s444_s1 + $0x70] sm:$0x1f] %vm220_vm4, %v213_v6  ;;  %v131_v10 = vsel %vm119_vm1, %v114_v9, 0.0  ;;  %v113_v11 = vsel %vm102_vm0, 0.0, %v75_v5 }
  0x97   :  { %231 = vst.msk [vmem:[%s444_s1 + $0x60] sm:$0xff] %vm217_vm3, %v205_v8  ;;  %232 = vst.msk [vmem:[%s444_s1 + $0x68] sm:$0xff] %vm217_vm3, %v167_v7  ;;  %v169_v12 = vrot.slane %v131_v10, 6  ;;  %v130_v13 = vsel %vm119_vm1, %v113_v11, 0.0 }
  0x98   :  { %v168_v14 = vrot.slane %v130_v13, 6  ;;  %v81_v15 = vpop.permute.xlu1 %80  ;;  %v79_v16 = vpop.permute.xlu0 %78 }
  0x99   :  { %v214_v17 = vsel %vm152_vm2, %v169_v12, 0.0  ;;  %v116_v18 = vsel %vm102_vm0, 0.0, %v81_v15  ;;  %v115_v19 = vsel %vm102_vm0, 0.0, %v79_v16 }
  0x9a   :  { %236 = vst.msk [vmem:[%s444_s1 + $0x88] sm:$0x1f] %vm220_vm4, %v214_v17  ;;  %v170_v20 = vsel %vm152_vm2, %v168_v14, %v169_v12  ;;  %v206_v21 = vsel %vm152_vm2, 0.0, %v168_v14  ;;  %v133_v22 = vsel %vm119_vm1, %v116_v18, 0.0  ;;  %v132_v23 = vsel %vm119_vm1, %v115_v19, 0.0 }
  0x9b   :  { %234 = vst.msk [vmem:[%s444_s1 + $0x78] sm:$0xff] %vm217_vm3, %v206_v21  ;;  %235 = vst.msk [vmem:[%s444_s1 + $0x80] sm:$0xff] %vm217_vm3, %v170_v20  ;;  %v172_v24 = vrot.slane %v133_v22, 6  ;;  %v171_v25 = vrot.slane %v132_v23, 6 }
  0x9c   :  { %v85_v26 = vpop.permute.xlu1 %84  ;;  %v83_v27 = vpop.permute.xlu0 %82 }
  0x9d   :  { %v215_v28 = vsel %vm152_vm2, %v172_v24, 0.0  ;;  %v173_v29 = vsel %vm152_vm2, %v171_v25, %v172_v24  ;;  %v207_v30 = vsel %vm152_vm2, 0.0, %v171_v25  ;;  %v118_v31 = vsel %vm102_vm0, 0.0, %v85_v26 }
  0x9e   :  { %239 = vst.msk [vmem:[%s444_s1 + $0xa0] sm:$0x1f] %vm220_vm4, %v215_v28  ;;  %v135_v32 = vsel %vm119_vm1, %v118_v31, 0.0  ;;  %v117_v33 = vsel %vm102_vm0, 0.0, %v83_v27 }
  0x9f   :  { %237 = vst.msk [vmem:[%s444_s1 + $0x90] sm:$0xff] %vm217_vm3, %v207_v30  ;;  %238 = vst.msk [vmem:[%s444_s1 + $0x98] sm:$0xff] %vm217_vm3, %v173_v29  ;;  %v175_v34 = vrot.slane %v135_v32, 6  ;;  %v134_v35 = vsel %vm119_vm1, %v117_v33, 0.0 }
  0xa0   :  { %v174_v36 = vrot.slane %v134_v35, 6 }
  0xa1   :  { %v216_v37 = vsel %vm152_vm2, %v175_v34, 0.0 }
  0xa2   :  { %242 = vst.msk [vmem:[%s444_s1 + $0xb8] sm:$0x1f] %vm220_vm4, %v216_v37  ;;  %v176_v38 = vsel %vm152_vm2, %v174_v36, %v175_v34  ;;  %v208_v39 = vsel %vm152_vm2, 0.0, %v174_v36 }
  0xa3   :  { %240 = vst.msk [vmem:[%s444_s1 + $0xa8] sm:$0xff] %vm217_vm3, %v208_v39  ;;  %241 = vst.msk [vmem:[%s444_s1 + $0xb0] sm:$0xff] %vm217_vm3, %v176_v38 }
  0xa4   :  { %247 = vsyncpa [#allocation3], 1 }

</bundles_post_ra>
